<compile_context>
chip_gen: v6e
topology: v6e:2x2x1
jax: 0.10.0
libtpu: 0.0.40
codegen_flags: <defaults>
</compile_context>

<pallas_src>
import functools

import jax
import jax.numpy as jnp
import numpy as np
from jax.experimental import pallas as pl
from jax.experimental.pallas import tpu as pltpu

_LANES = 128


def _vmem_capacity_bytes():
    """Generation-aware VMEM capacity; conservative (v7x) fallback."""
    try:
        cap = int(getattr(pltpu.get_tpu_info(), "vmem_capacity_bytes", 0))
        if cap > 0:
            return cap
    except Exception:
        pass
    return 64 << 20


def _footprint_bytes(c, t, itemsize, c16):
    """Conservative VMEM footprint estimate for a (1, C, T) tile."""
    blk = c * t * itemsize
    f = 4 * blk                      # x (2 buffers) + y (2 buffers)
    f += 3 * c * t * 4               # headroom for in-kernel f32 temporaries
    f += 3 * c * 4                   # sum / max / gain scratch
    f += 4 * c * max(1, c16) * 4     # w2ap + w2b (2 buffers each)
    f += 4 * max(1, c16) * 4         # emb term (2 buffers)
    f += 2 * c * 4                   # hmap output (2 buffers)
    return f


def _plan_tiles(hw, c, itemsize, c16, tile_override=None):
    """Pick spatial tile T, grid length NT and vmem_limit_bytes.

    If the whole per-batch (C, HW) slice fits the generation-aware budget,
    T == HW and NT == 1 (fused-resident: x read from HBM once).  Otherwise
    use the largest 128-multiple tile under a ~4 MiB block cap; the tail
    tile (pl.cdiv grid) is masked inside the kernel.
    """
    cap = _vmem_capacity_bytes()
    margin = 8 << 20

    if tile_override is not None:
        t = int(tile_override)
        assert t == hw or (t % _LANES == 0 and 0 < t <= hw)
    elif hw <= _LANES or (_footprint_bytes(c, hw, itemsize, c16) + margin
                          <= (cap * 6) // 10):
        t = hw                       # fused-resident path
    else:
        block_cap = min(4 << 20, cap // 12)
        t = max(_LANES, (block_cap // max(1, c * itemsize)) // _LANES * _LANES)
        t = min(t, (hw // _LANES) * _LANES)
    nt = pl.cdiv(hw, t)

    vmem_limit = int(min((cap * 9) // 10,
                         max(_footprint_bytes(c, t, itemsize, c16) + margin,
                             32 << 20)))
    return int(t), int(nt), vmem_limit


def _pcs_kernel(T, hw, inv_hw, has_tail, x_ref, emb_ref, w2ap_ref, w2b_ref,
                y_ref, hmap_ref, sum_sc, max_sc, gain_sc):
    """Fused reduce (pass 0) + apply (pass 1) over spatial tiles of one batch."""
    p = pl.program_id(1)
    t = pl.program_id(2)
    nt = pl.num_programs(2)

    # ---------------- pass 0: pooled stats + tiny fc2 -> gain ----------------
    @pl.when(p == 0)
    def _reduce():
        xf = x_ref[0].astype(jnp.float32)                       # (C, T)
        if has_tail:
            pos = t * T + jax.lax.broadcasted_iota(jnp.int32, xf.shape, 1)
            valid = pos < hw
            xs = jnp.where(valid, xf, 0.0)
            xm = jnp.where(valid, xf, -jnp.inf)
        else:
            xs = xf
            xm = xf
        part_sum = jnp.sum(xs, axis=1, keepdims=True)            # (C, 1)
        part_max = jnp.max(xm, axis=1, keepdims=True)            # (C, 1)

        @pl.when(t == 0)
        def _():
            sum_sc[...] = part_sum
            max_sc[...] = part_max

        @pl.when(t > 0)
        def _():
            sum_sc[...] = sum_sc[...] + part_sum
            max_sc[...] = jnp.maximum(max_sc[...], part_max)

        @pl.when(t == nt - 1)
        def _():
            avg = sum_sc[...] * inv_hw                           # (C, 1)
            mx = max_sc[...]                                     # (C, 1)
            e = emb_ref[0]                                       # (1, C16) emb term
            w2ap = w2ap_ref[...]                                 # (C, C16)
            # fc2 conv1 + ReLU per branch; conv2 is linear so the branches are
            # summed before the second conv.
            h_avg = jnp.maximum(
                jnp.sum(w2ap * avg, axis=0, keepdims=True) + e, 0.0)
            h_max = jnp.maximum(
                jnp.sum(w2ap * mx, axis=0, keepdims=True) + e, 0.0)
            h = h_avg + h_max                                    # (1, C16)
            out = jnp.sum(w2b_ref[...] * h, axis=1, keepdims=True)  # (C, 1)
            hm = jax.nn.sigmoid(out)
            hmap_ref[0] = hm
            gain_sc[...] = hm + 1.0

    # ---------------- pass 1: y = x * (1 + hmap) -----------------------------
    @pl.when(p == 1)
    def _apply():
        gain = gain_sc[...].astype(y_ref.dtype)                  # (C, 1)
        y_ref[0] = x_ref[0] * gain                               # native dtype


def personalized_channel_selection(x_nchw, emb, w1a, w1b, w2a, w2b, *,
                                    tile_override=None):
    """PyTorch-layout 1x1-conv weights:
         w1a (C, E), w1b (C, C), w2a (C//16, 2C), w2b (C, C//16).
       x_nchw: (B, C, H, W); emb: (B, E).
       Returns (y (B, C, H, W), hmap (B, C, 1, 1))."""
    B, C, H, W = x_nchw.shape
    HW = H * W
    C16 = w2a.shape[0]

    # Free reshape: channels on sublanes, spatial on lanes.
    x_flat = x_nchw.reshape(B, C, HW)

    # Hoisted embedding-only branch (tiny): fc1, then the emb half of fc2's
    # first conv.  Computed once per call, shared by the avg/max branches.
    f32 = jnp.float32
    emb_feat = jnp.maximum(emb.astype(f32) @ w1a.astype(f32).T, 0.0) \
        @ w1b.astype(f32).T                                          # (B, C)
    emb_term = (emb_feat @ w2a[:, C:].astype(f32).T).reshape(B, 1, C16)

    w2a_pT = jnp.transpose(w2a[:, :C]).astype(f32)                   # (C, C16)
    w2b_f = w2b.astype(f32)                                          # (C, C16)

    T, NT, vmem_limit = _plan_tiles(HW, C, x_nchw.dtype.itemsize, C16,
                                    tile_override=tile_override)
    has_tail = (HW % T) != 0

    kernel = functools.partial(_pcs_kernel, T, HW, 1.0 / float(HW), has_tail)

    # TODO(synk): for B == 1 on dual-TensorCore chips (v7x), add a 2-way
    # spatial split of the reduce (partial sum/max combined in the wrapper)
    # so both cores' HBM bandwidth is used.
    y_flat, hmap = pl.pallas_call(
        kernel,
        out_shape=(jax.ShapeDtypeStruct((B, C, HW), x_nchw.dtype),
                   jax.ShapeDtypeStruct((B, C, 1), jnp.float32)),
        grid_spec=pltpu.PrefetchScalarGridSpec(
            num_scalar_prefetch=0,
            grid=(B, 2, NT),
            in_specs=[
                pl.BlockSpec((1, C, T), lambda b, p, t: (b, 0, t)),    # x tile
                pl.BlockSpec((1, 1, C16), lambda b, p, t: (b, 0, 0)),  # emb term
                pl.BlockSpec((C, C16), lambda b, p, t: (0, 0)),        # fc2 conv1 (pooled half)
                pl.BlockSpec((C, C16), lambda b, p, t: (0, 0)),        # fc2 conv2
            ],
            out_specs=(
                # (b, 0, p*t): stays on block 0 during the reduce pass, so the
                # y buffer is never flushed before the apply pass writes it.
                pl.BlockSpec((1, C, T), lambda b, p, t: (b, 0, p * t)),
                pl.BlockSpec((1, C, 1), lambda b, p, t: (b, 0, 0)),
            ),
            scratch_shapes=[pltpu.VMEM((C, 1), jnp.float32),   # sum
                            pltpu.VMEM((C, 1), jnp.float32),   # max
                            pltpu.VMEM((C, 1), jnp.float32)],  # gain = 1 + hmap
        ),
        compiler_params=pltpu.CompilerParams(
            dimension_semantics=("parallel", "arbitrary", "arbitrary"),
            vmem_limit_bytes=vmem_limit),
    )(x_flat, emb_term, w2a_pT, w2b_f)

    # Free reshapes back to the module's output shapes.
    return y_flat.reshape(B, C, H, W), hmap.reshape(B, C, 1, 1)


def reference(x, emb, w1a, w1b, w2a, w2b):
    """Pure-JAX reference matching the PyTorch forward (PyTorch weight layout)."""
    avg = x.mean(axis=(2, 3))
    mx = x.max(axis=(2, 3))
    emb_feat = jnp.maximum(emb @ w1a.T, 0.0) @ w1b.T

    def fc2(p):
        cat = jnp.concatenate([p, emb_feat], axis=1)
        return jnp.maximum(cat @ w2a.T, 0.0) @ w2b.T

    hmap = jax.nn.sigmoid(fc2(avg) + fc2(mx))
    y = x * hmap[:, :, None, None] + x
    return y, hmap[:, :, None, None]


if __name__ == "__main__":
    key = jax.random.PRNGKey(0)

    def make_case(k, B, C, H, W, E):
        kx, ke, ka, kb, kc, kd = jax.random.split(k, 6)
        C16 = C // 16
        x = jax.random.normal(kx, (B, C, H, W), dtype=jnp.float32)
        emb = jax.random.normal(ke, (B, E), dtype=jnp.float32)
        w1a = 0.1 * jax.random.normal(ka, (C, E), dtype=jnp.float32)        # fc1[0]
        w1b = 0.1 * jax.random.normal(kb, (C, C), dtype=jnp.float32)        # fc1[2]
        w2a = 0.1 * jax.random.normal(kc, (C16, 2 * C), dtype=jnp.float32)  # fc2[0]
        w2b = 0.1 * jax.random.normal(kd, (C, C16), dtype=jnp.float32)      # fc2[2]
        return x, emb, w1a, w1b, w2a, w2b

    key1, key2 = jax.random.split(key)

    # Case 1: fused-resident path (whole per-batch (C, HW) slice in VMEM,
    # x read from HBM once).  f_dim=64 >= 16, emb_dim=32.
    x, emb, w1a, w1b, w2a, w2b = make_case(key1, 2, 64, 16, 16, 32)
    y, hmap = personalized_channel_selection(x, emb, w1a, w1b, w2a, w2b)
    jax.block_until_ready((y, hmap))
    y_ref, hmap_ref = reference(x, emb, w1a, w1b, w2a, w2b)
    assert y.shape == (2, 64, 16, 16) and hmap.shape == (2, 64, 1, 1)
    np.testing.assert_allclose(np.asarray(hmap), np.asarray(hmap_ref),
                               rtol=1e-4, atol=1e-4)
    np.testing.assert_allclose(np.asarray(y), np.asarray(y_ref),
                               rtol=1e-4, atol=1e-4)

    # Case 2: tiled path with a masked, non-divisible tail tile
    # (HW = 200, forced T = 128 -> NT = 2, tail of 72 valid lanes).
    x2, emb2, w1a2, w1b2, w2a2, w2b2 = make_case(key2, 2, 32, 10, 20, 16)
    y2, hmap2 = personalized_channel_selection(
        x2, emb2, w1a2, w1b2, w2a2, w2b2, tile_override=128)
    jax.block_until_ready((y2, hmap2))
    y2_ref, hmap2_ref = reference(x2, emb2, w1a2, w1b2, w2a2, w2b2)
    np.testing.assert_allclose(np.asarray(hmap2), np.asarray(hmap2_ref),
                               rtol=1e-4, atol=1e-4)
    np.testing.assert_allclose(np.asarray(y2), np.asarray(y2_ref),
                               rtol=1e-4, atol=1e-4)

    print("KERNEL_OK")
</pallas_src>

<mosaic_0001>
module attributes {stable_mosaic.version = 11 : i64} {
  func.func @_pcs_kernel(%arg0: i32, %arg1: i32, %arg2: i32, %arg3: memref<1x64x256xf32, #tpu.memory_space<vmem>>, %arg4: memref<1x1x4xf32, #tpu.memory_space<vmem>>, %arg5: memref<64x4xf32, #tpu.memory_space<vmem>>, %arg6: memref<64x4xf32, #tpu.memory_space<vmem>>, %arg7: memref<1x64x256xf32, #tpu.memory_space<vmem>>, %arg8: memref<1x64x1xf32, #tpu.memory_space<vmem>>, %arg9: memref<64x1xf32, #tpu.memory_space<vmem>>, %arg10: memref<64x1xf32, #tpu.memory_space<vmem>>, %arg11: memref<64x1xf32, #tpu.memory_space<vmem>>) attributes {dimension_semantics = [#tpu.dimension_semantics<parallel>, #tpu.dimension_semantics<arbitrary>, #tpu.dimension_semantics<arbitrary>], iteration_bounds = array<i64: 2, 2, 1>, scalar_prefetch = 0 : i64, scratch_operands = 3 : i64, tpu.core_type = #tpu.core_type<tc>, window_params = [{transform_indices = @transform_0, window_bounds = array<i64: 1, 64, 256>}, {transform_indices = @transform_1, window_bounds = array<i64: 1, 1, 4>}, {pipeline_mode = #tpu.pipeline_mode<synchronous>, transform_indices = @transform_2, window_bounds = array<i64: 64, 4>}, {pipeline_mode = #tpu.pipeline_mode<synchronous>, transform_indices = @transform_3, window_bounds = array<i64: 64, 4>}, {transform_indices = @transform_4, window_bounds = array<i64: 1, 64, 256>}, {transform_indices = @transform_5, window_bounds = array<i64: 1, 64, 1>}]} {
    %c0_i32 = arith.constant 0 : i32
    %0 = arith.cmpi eq, %arg1, %c0_i32 : i32
    %1 = arith.extui %0 : i1 to i32
    %c0_i32_0 = arith.constant 0 : i32
    %2 = arith.cmpi ne, %1, %c0_i32_0 : i32
    scf.if %2 {
      %c0 = arith.constant 0 : index
      %c0_2 = arith.constant 0 : index
      %c0_3 = arith.constant 0 : index
      %6 = vector.load %arg3[%c0, %c0_2, %c0_3] : memref<1x64x256xf32, #tpu.memory_space<vmem>>, vector<1x64x256xf32>
      %7 = vector.shape_cast %6 : vector<1x64x256xf32> to vector<64x256xf32>
      %cst = arith.constant dense<0.000000e+00> : vector<64xf32>
      %8 = vector.multi_reduction <add>, %7, %cst [1] : vector<64x256xf32> to vector<64xf32>
      %9 = vector.shape_cast %8 : vector<64xf32> to vector<64x1xf32>
      %cst_4 = arith.constant dense<0xFF800000> : vector<64xf32>
      %10 = vector.multi_reduction <maximumf>, %7, %cst_4 [1] : vector<64x256xf32> to vector<64xf32>
      %11 = vector.shape_cast %10 : vector<64xf32> to vector<64x1xf32>
      %c0_i32_5 = arith.constant 0 : i32
      %12 = arith.cmpi eq, %arg2, %c0_i32_5 : i32
      %13 = arith.extui %12 : i1 to i32
      %c0_i32_6 = arith.constant 0 : i32
      %14 = arith.cmpi ne, %13, %c0_i32_6 : i32
      scf.if %14 {
        %c0_11 = arith.constant 0 : index
        %c0_12 = arith.constant 0 : index
        %21 = vector.load %arg9[%c0_11, %c0_12] : memref<64x1xf32, #tpu.memory_space<vmem>>, vector<64x1xf32>
        tpu.vector_store %arg9[%c0_11, %c0_12], %9 {strides = array<i32>} : memref<64x1xf32, #tpu.memory_space<vmem>>, vector<64x1xf32>,
        %c0_13 = arith.constant 0 : index
        %c0_14 = arith.constant 0 : index
        %22 = vector.load %arg10[%c0_13, %c0_14] : memref<64x1xf32, #tpu.memory_space<vmem>>, vector<64x1xf32>
        tpu.vector_store %arg10[%c0_13, %c0_14], %11 {strides = array<i32>} : memref<64x1xf32, #tpu.memory_space<vmem>>, vector<64x1xf32>,
      } else {
      }
      %c0_i32_7 = arith.constant 0 : i32
      %15 = arith.cmpi sgt, %arg2, %c0_i32_7 : i32
      %16 = arith.extui %15 : i1 to i32
      %c0_i32_8 = arith.constant 0 : i32
      %17 = arith.cmpi ne, %16, %c0_i32_8 : i32
      scf.if %17 {
        %c0_11 = arith.constant 0 : index
        %c0_12 = arith.constant 0 : index
        %21 = vector.load %arg9[%c0_11, %c0_12] : memref<64x1xf32, #tpu.memory_space<vmem>>, vector<64x1xf32>
        %22 = arith.addf %21, %9 : vector<64x1xf32>
        %c0_13 = arith.constant 0 : index
        %c0_14 = arith.constant 0 : index
        %23 = vector.load %arg9[%c0_13, %c0_14] : memref<64x1xf32, #tpu.memory_space<vmem>>, vector<64x1xf32>
        tpu.vector_store %arg9[%c0_13, %c0_14], %22 {strides = array<i32>} : memref<64x1xf32, #tpu.memory_space<vmem>>, vector<64x1xf32>,
        %c0_15 = arith.constant 0 : index
        %c0_16 = arith.constant 0 : index
        %24 = vector.load %arg10[%c0_15, %c0_16] : memref<64x1xf32, #tpu.memory_space<vmem>>, vector<64x1xf32>
        %25 = arith.maximumf %24, %11 : vector<64x1xf32>
        %c0_17 = arith.constant 0 : index
        %c0_18 = arith.constant 0 : index
        %26 = vector.load %arg10[%c0_17, %c0_18] : memref<64x1xf32, #tpu.memory_space<vmem>>, vector<64x1xf32>
        tpu.vector_store %arg10[%c0_17, %c0_18], %25 {strides = array<i32>} : memref<64x1xf32, #tpu.memory_space<vmem>>, vector<64x1xf32>,
      } else {
      }
      %c0_i32_9 = arith.constant 0 : i32
      %18 = arith.cmpi eq, %arg2, %c0_i32_9 : i32
      %19 = arith.extui %18 : i1 to i32
      %c0_i32_10 = arith.constant 0 : i32
      %20 = arith.cmpi ne, %19, %c0_i32_10 : i32
      scf.if %20 {
        %c0_11 = arith.constant 0 : index
        %c0_12 = arith.constant 0 : index
        %21 = vector.load %arg9[%c0_11, %c0_12] : memref<64x1xf32, #tpu.memory_space<vmem>>, vector<64x1xf32>
        %cst_13 = arith.constant 3.906250e-03 : f32
        %22 = vector.broadcast %cst_13 : f32 to vector<64x1xf32>
        %23 = arith.mulf %21, %22 : vector<64x1xf32>
        %c0_14 = arith.constant 0 : index
        %c0_15 = arith.constant 0 : index
        %24 = vector.load %arg10[%c0_14, %c0_15] : memref<64x1xf32, #tpu.memory_space<vmem>>, vector<64x1xf32>
        %c0_16 = arith.constant 0 : index
        %c0_17 = arith.constant 0 : index
        %c0_18 = arith.constant 0 : index
        %25 = vector.load %arg4[%c0_16, %c0_17, %c0_18] : memref<1x1x4xf32, #tpu.memory_space<vmem>>, vector<1x1x4xf32>
        %26 = vector.shape_cast %25 : vector<1x1x4xf32> to vector<1x4xf32>
        %c0_19 = arith.constant 0 : index
        %c0_20 = arith.constant 0 : index
        %27 = vector.load %arg5[%c0_19, %c0_20] : memref<64x4xf32, #tpu.memory_space<vmem>>, vector<64x4xf32>
        %28 = vector.broadcast %23 : vector<64x1xf32> to vector<64x4xf32>
        %29 = arith.mulf %27, %28 : vector<64x4xf32>
        %cst_21 = arith.constant dense<0.000000e+00> : vector<4xf32>
        %30 = vector.multi_reduction <add>, %29, %cst_21 [0] : vector<64x4xf32> to vector<4xf32>
        %31 = vector.shape_cast %30 : vector<4xf32> to vector<1x4xf32>
        %32 = arith.addf %31, %26 : vector<1x4xf32>
        %cst_22 = arith.constant 0.000000e+00 : f32
        %33 = vector.broadcast %cst_22 : f32 to vector<1x4xf32>
        %34 = arith.maximumf %32, %33 : vector<1x4xf32>
        %35 = vector.broadcast %24 : vector<64x1xf32> to vector<64x4xf32>
        %36 = arith.mulf %27, %35 : vector<64x4xf32>
        %cst_23 = arith.constant dense<0.000000e+00> : vector<4xf32>
        %37 = vector.multi_reduction <add>, %36, %cst_23 [0] : vector<64x4xf32> to vector<4xf32>
        %38 = vector.shape_cast %37 : vector<4xf32> to vector<1x4xf32>
        %39 = arith.addf %38, %26 : vector<1x4xf32>
        %cst_24 = arith.constant 0.000000e+00 : f32
        %40 = vector.broadcast %cst_24 : f32 to vector<1x4xf32>
        %41 = arith.maximumf %39, %40 : vector<1x4xf32>
        %42 = arith.addf %34, %41 : vector<1x4xf32>
        %c0_25 = arith.constant 0 : index
        %c0_26 = arith.constant 0 : index
        %43 = vector.load %arg6[%c0_25, %c0_26] : memref<64x4xf32, #tpu.memory_space<vmem>>, vector<64x4xf32>
        %44 = vector.broadcast %42 : vector<1x4xf32> to vector<64x4xf32>
        %45 = arith.mulf %43, %44 : vector<64x4xf32>
        %cst_27 = arith.constant dense<0.000000e+00> : vector<64xf32>
        %46 = vector.multi_reduction <add>, %45, %cst_27 [1] : vector<64x4xf32> to vector<64xf32>
        %47 = vector.shape_cast %46 : vector<64xf32> to vector<64x1xf32>
        %48 = arith.negf %47 : vector<64x1xf32>
        %49 = math.exp %48 : vector<64x1xf32>
        %cst_28 = arith.constant 1.000000e+00 : f32
        %50 = vector.broadcast %cst_28 : f32 to vector<64x1xf32>
        %51 = arith.addf %50, %49 : vector<64x1xf32>
        %52 = arith.divf %50, %51 : vector<64x1xf32>
        %c0_29 = arith.constant 0 : index
        %c0_30 = arith.constant 0 : index
        %c0_31 = arith.constant 0 : index
        %53 = vector.load %arg8[%c0_29, %c0_30, %c0_31] : memref<1x64x1xf32, #tpu.memory_space<vmem>>, vector<1x64x1xf32>
        %54 = vector.shape_cast %53 : vector<1x64x1xf32> to vector<64x1xf32>
        %55 = vector.shape_cast %52 : vector<64x1xf32> to vector<1x64x1xf32>
        tpu.vector_store %arg8[%c0_29, %c0_30, %c0_31], %55 {strides = array<i32>} : memref<1x64x1xf32, #tpu.memory_space<vmem>>, vector<1x64x1xf32>,
        %cst_32 = arith.constant 1.000000e+00 : f32
        %56 = vector.broadcast %cst_32 : f32 to vector<64x1xf32>
        %57 = arith.addf %52, %56 : vector<64x1xf32>
        %c0_33 = arith.constant 0 : index
        %c0_34 = arith.constant 0 : index
        %58 = vector.load %arg11[%c0_33, %c0_34] : memref<64x1xf32, #tpu.memory_space<vmem>>, vector<64x1xf32>
        tpu.vector_store %arg11[%c0_33, %c0_34], %57 {strides = array<i32>} : memref<64x1xf32, #tpu.memory_space<vmem>>, vector<64x1xf32>,
      } else {
      }
    } else {
    }
    %c1_i32 = arith.constant 1 : i32
    %3 = arith.cmpi eq, %arg1, %c1_i32 : i32
    %4 = arith.extui %3 : i1 to i32
    %c0_i32_1 = arith.constant 0 : i32
    %5 = arith.cmpi ne, %4, %c0_i32_1 : i32
    scf.if %5 {
      %c0 = arith.constant 0 : index
      %c0_2 = arith.constant 0 : index
      %6 = vector.load %arg11[%c0, %c0_2] : memref<64x1xf32, #tpu.memory_space<vmem>>, vector<64x1xf32>
      %c0_3 = arith.constant 0 : index
      %c0_4 = arith.constant 0 : index
      %c0_5 = arith.constant 0 : index
      %7 = vector.load %arg3[%c0_3, %c0_4, %c0_5] : memref<1x64x256xf32, #tpu.memory_space<vmem>>, vector<1x64x256xf32>
      %8 = vector.shape_cast %7 : vector<1x64x256xf32> to vector<64x256xf32>
      %9 = vector.broadcast %6 : vector<64x1xf32> to vector<64x256xf32>
      %10 = arith.mulf %8, %9 : vector<64x256xf32>
      %c0_6 = arith.constant 0 : index
      %c0_7 = arith.constant 0 : index
      %c0_8 = arith.constant 0 : index
      %11 = vector.load %arg7[%c0_6, %c0_7, %c0_8] : memref<1x64x256xf32, #tpu.memory_space<vmem>>, vector<1x64x256xf32>
      %12 = vector.shape_cast %11 : vector<1x64x256xf32> to vector<64x256xf32>
      %13 = vector.shape_cast %10 : vector<64x256xf32> to vector<1x64x256xf32>
      tpu.vector_store %arg7[%c0_6, %c0_7, %c0_8], %13 {strides = array<i32>} : memref<1x64x256xf32, #tpu.memory_space<vmem>>, vector<1x64x256xf32>,
    } else {
    }
    return
  }
  func.func @transform_0(%arg0: i32, %arg1: i32, %arg2: i32) -> (i32, i32, i32) {
    %c0_i32 = arith.constant 0 : i32
    %c0_i32_0 = arith.constant 0 : i32
    return %arg0, %c0_i32, %arg2 : i32, i32, i32
  }
  func.func @transform_1(%arg0: i32, %arg1: i32, %arg2: i32) -> (i32, i32, i32) {
    %c0_i32 = arith.constant 0 : i32
    %c0_i32_0 = arith.constant 0 : i32
    %c0_i32_1 = arith.constant 0 : i32
    return %arg0, %c0_i32, %c0_i32_0 : i32, i32, i32
  }
  func.func @transform_2(%arg0: i32, %arg1: i32, %arg2: i32) -> (i32, i32) {
    %c0_i32 = arith.constant 0 : i32
    %c0_i32_0 = arith.constant 0 : i32
    %c0_i32_1 = arith.constant 0 : i32
    return %c0_i32, %c0_i32_0 : i32, i32
  }
  func.func @transform_3(%arg0: i32, %arg1: i32, %arg2: i32) -> (i32, i32) {
    %c0_i32 = arith.constant 0 : i32
    %c0_i32_0 = arith.constant 0 : i32
    %c0_i32_1 = arith.constant 0 : i32
    return %c0_i32, %c0_i32_0 : i32, i32
  }
  func.func @transform_4(%arg0: i32, %arg1: i32, %arg2: i32) -> (i32, i32, i32) {
    %0 = arith.muli %arg1, %arg2 : i32
    %c0_i32 = arith.constant 0 : i32
    %c0_i32_0 = arith.constant 0 : i32
    return %arg0, %c0_i32, %0 : i32, i32, i32
  }
  func.func @transform_5(%arg0: i32, %arg1: i32, %arg2: i32) -> (i32, i32, i32) {
    %c0_i32 = arith.constant 0 : i32
    %c0_i32_0 = arith.constant 0 : i32
    %c0_i32_1 = arith.constant 0 : i32
    return %arg0, %c0_i32, %c0_i32_0 : i32, i32, i32
  }
}

</mosaic_0001>

<bundles_post_ra>
// kernel: tpu_custom_call.1
= control target key start
LH: loop header
LB: loop body
LE: loop exit
PB: predicated region body
PF: predicated region fallthrough
CT: control target
= control target key end

     0   :  { %11 = vsyncpa [#allocation6], 0  ;;  %s1655_s0 = inlined_call_operand.hbm [shape: f32[2,64,256], index: 0, kind: input, shape index: {}]   ;;  %s1656_s1 = inlined_call_operand.vmem [shape: f32[2,1,4], index: 1, kind: input, shape index: {}]   ;;  %s1657_s2 = inlined_call_operand.vmem [shape: f32[64,4], index: 2, kind: input, shape index: {}]   ;;  %s1658_s3 = inlined_call_operand.vmem [shape: f32[64,4], index: 3, kind: input, shape index: {}]   ;;  %s1659_s4 = inlined_call_operand.hbm [shape: f32[2,64,256], index: 4, kind: output, shape index: {0}]   ;;  %s1660_s5 = inlined_call_operand.vmem [shape: f32[2,64,1], index: 5, kind: output, shape index: {1}]  }
   0x1   :  { %13 = vsyncpa [#allocation6 + $0x1], 0 }
   0x2   :  { %14 = vsyncpa [#allocation7], 0 }
   0x3   :  { %16 = vsyncpa [#allocation7 + $0x1], 0  ;;  %s1305_s18 = smov 0   ;;  %s1307_s19 = smov 0  }
   0x4   :  { %s1309_s20 = smov 0   ;;  %s1311_s21 = smov 0  }
   0x5   :  { %s1313_s22 = smov 0   ;;  %s1315_s23 = smov 0  }
   0x6   :  { %s1317_s24 = smov 0   ;;  %s1319_s25 = smov 0  }
   0x7 LB: > { %s991_s26 = sadd.s32 4294967295, %s1265_s25   ;;  %s992_s27 = sadd.s32 4294967294, %s1265_s25   ;;  %s1265_s25 = sphi %s1319_s25, %s22_s25   ;;  %s1261_s24 = sphi %s1317_s24, %s1677_s24   ;;  %s1257_s23 = sphi %s1315_s23, %s1676_s23   ;;  %s1253_s22 = sphi %s1313_s22, %s1675_s22   ;;  %s1249_s21 = sphi %s1311_s21, %s1674_s21   ;;  %s1245_s20 = sphi %s1309_s20, %s1673_s20   ;;  %s1241_s19 = sphi %s1307_s19, %s1672_s19   ;;  %s1237_s18 = sphi %s1305_s18, %s1671_s18  }
   0x8   : > { %s37_s28 = sadd.s32 1, %s1257_s23  ;;  %s41_s29 = sadd.s32 1, %s1261_s24 }
   0x9   : > { %p39_p0 = scmp.ge.s32.totalorder %s37_s28, 2  ;;  %s50_s30 = sadd.s32 1, %s1245_s20 }
   0xa   : > { %p57_p1 = scmp.ne.s32.totalorder %s1245_s20, %s1241_s19  ;;  %p58_p2 = scmp.eq.s32.totalorder %s1265_s25, 0 }
   0xb   : > { %s1679_s28 = smov (%p39_p0, %s37_s28), 0  ;;  %s1681_s29 = smov (!%p39_p0, %s41_s29), %s1261_s24 }
   0xc   : > { %1662 = sst [smem:[#allocation11_spill]] %s1679_s28  ;;  %p1356_p3 = por %p58_p2, %p57_p1 }
   0xd   : > { %p63_p4 = scmp.ne.s32.totalorder %s1241_s19, %s1237_s18  ;;  %p43_p5 = scmp.ge.s32.totalorder %s1681_s29, 2 }
   0xe   : > { %p64_p6 = scmp.eq.s32.totalorder %s991_s26, 0  ;;  %p159_p7 = scmp.eq.s32.totalorder %s991_s26, 3 }
   0xf   : > { %p165_p8 = scmp.eq.s32.totalorder %s992_s27, 3  ;;  %s1683_s29 = smov (%p43_p5, %s1681_s29), 0 }
  0x10   : > { %1664 = sst [smem:[#allocation12_spill]] %s1683_s29  ;;  %p1364_p9 = por %p64_p6, %p63_p4 }
  0x11   : > { %p1368_p10 = por %p159_p7, %p57_p1  ;;  %s45_s9 = ssub.s32 %s1261_s24, %s1683_s29 }
  0x12   : > { %p1374_p11 = por %p165_p8, %p63_p4  ;;  %p48_p12 = scmp.eq.s32.totalorder %s45_s9, 0 }
  0x13   : > { %p1033_p13 = scmp.lt.s32.totalorder %s1265_s25, 4  ;;  %s217_s11 = sand.u32 1, %s1245_s20  }
  0x14   : > { %s1381_s12 = scalar_select %p48_p12, %s1245_s20, %s50_s30  }
  0x15   : > { %s995_s13 = sshll.u32 %s217_s11, 7  ;;  %s1018_s14 = sshll.u32 %s1261_s24, 11 }
  0x16   : > { %s229_s17 = scalar_lea.hbm %s1655_s0, %s1018_s14  ;;  %s221_s26 = scalar_lea.vmem [#allocation5], %s995_s13 }
  0x17   : > { %s230_s27 = sshll.u32 %s221_s26, 4  ;;  %p1389_p0 = pnand %p1033_p13, %p1356_p3  ;;  %s231_s27 = int_to_ptr.vmem [resolvable:$true] %s230_s27 }
  0x18   : > { %p998_p1 = scmp.ge.s32.totalorder %s1265_s25, 1  ;;  %s218_s9 = scalar_lea.sflag [#allocation6], %s217_s11 }
  0x19   : > { %p1143_p2 = pneg %p1389_p0  ;;  %s1154_s30 = scalar_lea.vmem %s231_s27, 2048 }
  0x1a   : > { %p1155_p4 = scmp.ne.s32.totalorder %s231_s27, %s1154_s30  ;;  %s1267_s28 = smov [#allocation5]  }
  0x1b   : > { %s1159_s15 = sshll.u32 %s1267_s28, 4  ;;  %s1160_s15 = int_to_ptr.vmem [resolvable:$false] %s1159_s15 }
  0x1c   : > { %p1157_p5 = pnand %p1155_p4, %p1143_p2  ;;  %s1161_s13 = scalar_lea.vmem %s1160_s15, 4096 }
  0x1d   : > { %p1162_p7 = scmp.lt.s32.totalorder %s231_s27, %s1160_s15  ;;  %p1163_p8 = scmp.lt.s32.totalorder %s1161_s13, %s1154_s30 }
  0x1e   : > { %p1158_p6 = pneg %p1157_p5 }
  0x1f   : > { %p1164_p12 = por %p1163_p8, %p1162_p7 }
  0x21   : > { %p1165_p3 = pnand %p1164_p12, %p1158_p6 }
  0x23   : > { %1168 = shalt.err (!%p1165_p3)
}
  0x24   : > { %s1268_s6 = smov 256   ;;  %s1269_s11 = smov 16  }
  0x25   : > { %1028 = dma.hbm_to_vmem [thread:$0]  (!%p1389_p0), %s229_s17, 2048, %s231_s27, %s218_s9, %s1268_s6, %s1268_s6, %s1269_s11  }
  0x26   : > { %p244_p13 = scmp.lt.s32.totalorder %s1265_s25, 5 }
  0x28   : > { %p245_p2 = pnand %p998_p1, %p244_p13 }
  0x29   : > { %s1402_s28 = sand.u32 (!%p245_p2), 1, %s1241_s19  }
  0x2a   : > { %248 = sbr.rel (%p245_p2) target bundleno = 761 (0x2f9), region = 36  ;;  %s999_s14 = sshll.u32 (!%p245_p2), %s1402_s28, 7 }
  0x2b   : > { %s251_s16 = scalar_lea.sflag (!%p245_p2), [#allocation6], %s1402_s28  ;;  %s1406_s26 = scalar_lea.vmem (!%p245_p2), [#allocation5], %s999_s14 }
  0x2f   : > { %1228 = dma.done.wait (%p1364_p9), %s251_s16, 2048  }
  0x30   : > { %1230 = vsyncadd (%p1364_p9), %s251_s16, 4294965248  ;;  %p290_p0 = scmp.lt.s32.totalorder %s1253_s22, 1  ;;  %s1426_s11 = scalar_lea.vmem [#allocation8], %s999_s14 }
  0x31   : > { %p1003_p9 = scmp.ne.s32.totalorder %s1249_s21, 0 }
  0x32   : > { %s1414_s29 = scalar_select %p290_p0, %s1253_s22, 1 }
  0x33   : > { %303 = sbr.rel (%p1003_p9) target bundleno = 588 (0x24c), region = 44 }
  0x34   : > { %s292_s9 = scalar_lea.vmem %s1656_s1, %s1414_s29  ;;  %s1019_s30 = sshll.u32 %s1414_s29, 6 }
  0x35   : > { %s1424_s6 = scalar_lea.vmem %s1660_s5, %s1019_s30 }
  0x38   : > { %v308_v0 = vld [vmem:[%s1406_s26 + $0x20] sm:$0xff]  ;;  %v309_v1 = vld [vmem:[%s1406_s26 + $0x28] sm:$0xff]  ;;  %v306_v5 = vld [vmem:[%s1406_s26 + $0x10] sm:$0xff]  ;;  %v1270_v29 = vmov 0   ;;  %vm372_vm0 = vcmask 7168   ;;  %vm526_vm1 = vcmask 31744  }
  0x39   : > { %v304_v2 = vld [vmem:[%s1406_s26] sm:$0xff]  ;;  %v326_v3 = vadd.f32 %v309_v1, %v308_v0  ;;  %v305_v4 = vld [vmem:[%s1406_s26 + $0x8] sm:$0xff]  ;;  %v307_v6 = vld [vmem:[%s1406_s26 + $0x18] sm:$0xff]  ;;  %v350_v17 = vmax.f32 %v308_v0, %v309_v1  ;;  %1106 = vset.pattern.permute.xlu0 %v1270_v29  ;;  %1105 = vset.pattern.permute.xlu1 %v1270_v29 }
  0x3a   : > { %v320_v7 = vadd.f32 %v305_v4, %v304_v2  ;;  %v344_v8 = vmax.f32 %v304_v2, %v305_v4  ;;  %v323_v9 = vadd.f32 %v307_v6, %v306_v5  ;;  %v310_v10 = vld [vmem:[%s1406_s26 + $0x30] sm:$0xff]  ;;  %v311_v11 = vld [vmem:[%s1406_s26 + $0x38] sm:$0xff]  ;;  %v347_v13 = vmax.f32 %v306_v5, %v307_v6  ;;  %v312_v14 = vld [vmem:[%s1406_s26 + $0x40] sm:$0xff] }
  0x3b   : > { %327 = vadd.xlane.f32.xlu1 %v326_v3  ;;  %v329_v12 = vadd.f32 %v311_v11, %v310_v10  ;;  %v313_v15 = vld [vmem:[%s1406_s26 + $0x48] sm:$0xff]  ;;  %v314_v18 = vld [vmem:[%s1406_s26 + $0x50] sm:$0xff]  ;;  %v315_v19 = vld [vmem:[%s1406_s26 + $0x58] sm:$0xff]  ;;  %v353_v21 = vmax.f32 %v310_v10, %v311_v11 }
  0x3c   : > { %321 = vadd.xlane.f32.xlu0 %v320_v7  ;;  %v332_v16 = vadd.f32 %v313_v15, %v312_v14  ;;  %v335_v20 = vadd.f32 %v315_v19, %v314_v18  ;;  %v316_v22 = vld [vmem:[%s1406_s26 + $0x60] sm:$0xff]  ;;  %v317_v23 = vld [vmem:[%s1406_s26 + $0x68] sm:$0xff]  ;;  %v356_v25 = vmax.f32 %v312_v14, %v313_v15  ;;  %v318_v26 = vld [vmem:[%s1406_s26 + $0x70] sm:$0xff]  ;;  %v359_v30 = vmax.f32 %v314_v18, %v315_v19 }
  0x3d   : > { %v338_v24 = vadd.f32 %v317_v23, %v316_v22  ;;  %v319_v27 = vld [vmem:[%s1406_s26 + $0x78] sm:$0xff]  ;;  %v362_v32 = vmax.f32 %v316_v22, %v317_v23  ;;  %v470_v14 = vld [vmem:[%s1657_s2] sm:$0xff]  ;;  %v472_v15 = vld [vmem:[%s1657_s2 + $0x10] sm:$0xff] }
  0x3e   : > { %v341_v28 = vadd.f32 %v319_v27, %v318_v26  ;;  %v365_v31 = vmax.f32 %v318_v26, %v319_v27  ;;  %v473_v19 = vld [vmem:[%s1657_s2 + $0x18] sm:$0xff]  ;;  %v474_v22 = vld [vmem:[%s1657_s2 + $0x20] sm:$0xff] }
  0x3f   : > { %345 = vmax.xlane.f32.xlu1 %v344_v8 }
  0x40   : > { %324 = vadd.xlane.f32.xlu0 %v323_v9 }
  0x43   : > { %330 = vadd.xlane.f32.xlu1 %v329_v12 }
  0x44   : > { %348 = vmax.xlane.f32.xlu0 %v347_v13  ;;  %v471_v13 = vld [vmem:[%s1657_s2 + $0x8] sm:$0xff] }
  0x47   : > { %333 = vadd.xlane.f32.xlu1 %v332_v16 }
  0x48   : > { %351 = vmax.xlane.f32.xlu0 %v350_v17 }
  0x4b   : > { %336 = vadd.xlane.f32.xlu1 %v335_v20 }
  0x4c   : > { %354 = vmax.xlane.f32.xlu0 %v353_v21 }
  0x4f   : > { %339 = vadd.xlane.f32.xlu1 %v338_v24 }
  0x50   : > { %357 = vmax.xlane.f32.xlu0 %v356_v25 }
  0x53   : > { %342 = vadd.xlane.f32.xlu1 %v341_v28  ;;  %v475_v28 = vld [vmem:[%s1657_s2 + $0x28] sm:$0xff] }
  0x54   : > { %360 = vmax.xlane.f32.xlu0 %v359_v30 }
  0x57   : > { %366 = vmax.xlane.f32.xlu1 %v365_v31 }
  0x58   : > { %363 = vmax.xlane.f32.xlu0 %v362_v32 }
  0xc4   : > { %v328_v33 = vpop.xlane.xlu1 %327 }
  0xc5   : > { %375 = vst.msk [vmem:[#allocation2 + $0x10] sm:$0xff] %vm372_vm0, %v328_v33  ;;  %v322_v34 = vpop.xlane.xlu0 %321 }
  0xc6   : > { %373 = vst.msk [vmem:[#allocation2] sm:$0xff] %vm372_vm0, %v322_v34 }
  0xc8   : > { %v346_v35 = vpop.xlane.xlu1 %345 }
  0xc9   : > { %381 = vst.msk [vmem:[#allocation3] sm:$0xff] %vm372_vm0, %v346_v35  ;;  %v325_v36 = vpop.xlane.xlu0 %324 }
  0xca   : > { %374 = vst.msk [vmem:[#allocation2 + $0x8] sm:$0xff] %vm372_vm0, %v325_v36 }
  0xcc   : > { %v331_v37 = vpop.xlane.xlu1 %330  ;;  %v447_v56 = vld [vmem:[#allocation2 + $0x10] sm:$0xff] }
  0xcd   : > { %v349_v38 = vpop.xlane.xlu0 %348  ;;  %376 = vst.msk [vmem:[#allocation2 + $0x18] sm:$0xff] %vm372_vm0, %v331_v37  ;;  %v445_v57 = vld [vmem:[#allocation2] sm:$0xff]  ;;  %v455_v58 = vmul.f32 0.00390625, %v447_v56 }
  0xce   : > { %382 = vst.msk [vmem:[#allocation3 + $0x8] sm:$0xff] %vm372_vm0, %v349_v38  ;;  %v453_v59 = vmul.f32 0.00390625, %v445_v57 }
  0xd0   : > { %v461_v39 = vld [vmem:[#allocation3] sm:$0xff]  ;;  %v334_v40 = vpop.xlane.xlu1 %333 }
  0xd1   : > { %v352_v41 = vpop.xlane.xlu0 %351  ;;  %552 = vperm.xlu1 %1105, %v461_v39   ;;  %377 = vst.msk [vmem:[#allocation2 + $0x20] sm:$0xff] %vm372_vm0, %v334_v40  ;;  %v446_v51 = vld [vmem:[#allocation2 + $0x8] sm:$0xff]  ;;  %v476_v40 = vld [vmem:[%s1657_s2 + $0x30] sm:$0xff] }
  0xd2   : > { %383 = vst.msk [vmem:[#allocation3 + $0x10] sm:$0xff] %vm372_vm0, %v352_v41  ;;  %v454_v52 = vmul.f32 0.00390625, %v446_v51 }
  0xd4   : > { %v337_v42 = vpop.xlane.xlu1 %336  ;;  %v448_v60 = vld [vmem:[#allocation2 + $0x18] sm:$0xff] }
  0xd5   : > { %v355_v43 = vpop.xlane.xlu0 %354  ;;  %v462_v44 = vld [vmem:[#allocation3 + $0x8] sm:$0xff]  ;;  %378 = vst.msk [vmem:[#allocation2 + $0x28] sm:$0xff] %vm372_vm0, %v337_v42  ;;  %v456_v62 = vmul.f32 0.00390625, %v448_v60 }
  0xd6   : > { %384 = vst.msk [vmem:[#allocation3 + $0x18] sm:$0xff] %vm372_vm0, %v355_v43  ;;  %557 = vperm.xlu1 %1105, %v462_v44  }
  0xd8   : > { %v340_v45 = vpop.xlane.xlu1 %339  ;;  %v449_v63 = vld [vmem:[#allocation2 + $0x20] sm:$0xff] }
  0xd9   : > { %v358_v46 = vpop.xlane.xlu0 %357  ;;  %v463_v47 = vld [vmem:[#allocation3 + $0x10] sm:$0xff]  ;;  %379 = vst.msk [vmem:[#allocation2 + $0x30] sm:$0xff] %vm372_vm0, %v340_v45  ;;  %v457_v1 = vmul.f32 0.00390625, %v449_v63 }
  0xda   : > { %385 = vst.msk [vmem:[#allocation3 + $0x20] sm:$0xff] %vm372_vm0, %v358_v46  ;;  %562 = vperm.xlu1 %1105, %v463_v47  }
  0xdc   : > { %v343_v48 = vpop.xlane.xlu1 %342  ;;  %v450_v2 = vld [vmem:[#allocation2 + $0x28] sm:$0xff] }
  0xdd   : > { %v464_v49 = vld [vmem:[#allocation3 + $0x18] sm:$0xff]  ;;  %v361_v50 = vpop.xlane.xlu0 %360  ;;  %380 = vst.msk [vmem:[#allocation2 + $0x38] sm:$0xff] %vm372_vm0, %v343_v48  ;;  %v458_v4 = vmul.f32 0.00390625, %v450_v2 }
  0xde   : > { %567 = vperm.xlu1 %1105, %v464_v49   ;;  %386 = vst.msk [vmem:[#allocation3 + $0x28] sm:$0xff] %vm372_vm0, %v361_v50 }
  0xe0   : > { %v367_v53 = vpop.xlane.xlu1 %366  ;;  %v451_v5 = vld [vmem:[#allocation2 + $0x30] sm:$0xff] }
  0xe1   : > { %v465_v54 = vld [vmem:[#allocation3 + $0x20] sm:$0xff]  ;;  %v364_v55 = vpop.xlane.xlu0 %363  ;;  %388 = vst.msk [vmem:[#allocation3 + $0x38] sm:$0xff] %vm372_vm0, %v367_v53  ;;  %v459_v6 = vmul.f32 0.00390625, %v451_v5 }
  0xe2   : > { %485 = vperm.xlu1 %1105, %v454_v52   ;;  %572 = vperm.xlu0 %1106, %v465_v54   ;;  %387 = vst.msk [vmem:[#allocation3 + $0x30] sm:$0xff] %vm372_vm0, %v364_v55  ;;  %v477_v52 = vld [vmem:[%s1657_s2 + $0x38] sm:$0xff] }
  0xe4   : > { %v452_v7 = vld [vmem:[#allocation2 + $0x38] sm:$0xff] }
  0xe5   : > { %v466_v61 = vld [vmem:[#allocation3 + $0x28] sm:$0xff]  ;;  %v460_v8 = vmul.f32 0.00390625, %v452_v7 }
  0xe6   : > { %490 = vperm.xlu1 %1105, %v455_v58   ;;  %480 = vperm.xlu0 %1106, %v453_v59  }
  0xe8   : > { %v468_v3 = vld [vmem:[#allocation3 + $0x38] sm:$0xff] }
  0xe9   : > { %v467_v0 = vld [vmem:[#allocation3 + $0x30] sm:$0xff] }
  0xea   : > { %495 = vperm.xlu1 %1105, %v456_v62   ;;  %577 = vperm.xlu0 %1106, %v466_v61  }
  0xee   : > { %500 = vperm.xlu1 %1105, %v457_v1   ;;  %582 = vperm.xlu0 %1106, %v467_v0  }
  0xf2   : > { %505 = vperm.xlu1 %1105, %v458_v4   ;;  %587 = vperm.xlu0 %1106, %v468_v3  }
  0xf6   : > { %510 = vperm.xlu1 %1105, %v459_v6  }
  0xfa   : > { %515 = vperm.xlu1 %1105, %v460_v8  }
 0x14c   : > { %v553_v9 = vpop.permute.xlu1 %552 }
 0x14d   : > { %v590_v20 = vmul.f32 %v553_v9, %v470_v14 }
 0x14f   : > { %v598_v29 = vsel %vm526_vm1, %v590_v20, 0.0 }
 0x151   : > { %v558_v10 = vpop.permute.xlu1 %557 }
 0x152   : > { %v591_v18 = vmul.f32 %v558_v10, %v471_v13 }
 0x154   : > { %v599_v25 = vsel %vm526_vm1, %v591_v18, 0.0 }
 0x155   : > { %v563_v11 = vpop.permute.xlu1 %562  ;;  %v600_v33 = vadd.f32 %v599_v25, %v598_v29 }
 0x156   : > { %v592_v21 = vmul.f32 %v563_v11, %v472_v15 }
 0x158   : > { %v601_v30 = vsel %vm526_vm1, %v592_v21, 0.0 }
 0x159   : > { %v568_v12 = vpop.permute.xlu1 %567  ;;  %v602_v39 = vadd.f32 %v601_v30, %v600_v33 }
 0x15a   : > { %v593_v26 = vmul.f32 %v568_v12, %v473_v19 }
 0x15c   : > { %v603_v36 = vsel %vm526_vm1, %v593_v26, 0.0  ;;  %v469_v26 = vld [vmem:[%s292_s9] sm:$0x1] }
 0x15d   : > { %v486_v16 = vpop.permute.xlu1 %485  ;;  %v573_v17 = vpop.permute.xlu0 %572  ;;  %v604_v44 = vadd.f32 %v603_v36, %v602_v39  ;;  %v623_v36 = vld [vmem:[%s1658_s3 + $0x8] sm:$0xff]  ;;  %v624_v39 = vld [vmem:[%s1658_s3 + $0x10] sm:$0xff] }
 0x15e   : > { %v519_v31 = vmul.f32 %v486_v16, %v471_v13  ;;  %v594_v32 = vmul.f32 %v573_v17, %v474_v22 }
 0x160   : > { %v528_v41 = vsel %vm526_vm1, %v519_v31, 0.0  ;;  %v605_v42 = vsel %vm526_vm1, %v594_v32, 0.0 }
 0x161   : > { %v491_v23 = vpop.permute.xlu1 %490  ;;  %v481_v24 = vpop.permute.xlu0 %480  ;;  %v606_v51 = vadd.f32 %v605_v42, %v604_v44 }
 0x162   : > { %v518_v27 = vmul.f32 %v481_v24, %v470_v14  ;;  %v520_v43 = vmul.f32 %v491_v23, %v472_v15  ;;  %v630_v24 = vlaneseq }
 0x164   : > { %v527_v37 = vsel %vm526_vm1, %v518_v27, 0.0  ;;  %v530_v53 = vsel %vm526_vm1, %v520_v43, 0.0  ;;  %v631_v29 = vshrl.u32 %v630_v24, 7 }
 0x165   : > { %v496_v34 = vpop.permute.xlu1 %495  ;;  %v578_v35 = vpop.permute.xlu0 %577  ;;  %v529_v45 = vadd.f32 %v528_v41, %v527_v37  ;;  %v622_v37 = vld [vmem:[%s1658_s3] sm:$0xff] }
 0x166   : > { %v595_v38 = vmul.f32 %v578_v35, %v475_v28  ;;  %v521_v48 = vmul.f32 %v496_v34, %v473_v19  ;;  %v632_v33 = vsub.s32 0, %v631_v29 }
 0x167   : > { %v531_v56 = vadd.f32 %v530_v53, %v529_v45  ;;  %v628_v53 = vld [vmem:[%s1658_s3 + $0x30] sm:$0xff] }
 0x168   : > { %v607_v49 = vsel %vm526_vm1, %v595_v38, 0.0  ;;  %v532_v60 = vsel %vm526_vm1, %v521_v48, 0.0  ;;  %v627_v48 = vld [vmem:[%s1658_s3 + $0x28] sm:$0xff] }
 0x169   : > { %v501_v46 = vpop.permute.xlu1 %500  ;;  %v583_v47 = vpop.permute.xlu0 %582  ;;  %v608_v57 = vadd.f32 %v607_v49, %v606_v51  ;;  %v533_v2 = vadd.f32 %v532_v60, %v531_v56 }
 0x16a   : > { %v596_v50 = vmul.f32 %v583_v47, %v476_v40  ;;  %v522_v54 = vmul.f32 %v501_v46, %v474_v22  ;;  %v626_v47 = vld [vmem:[%s1658_s3 + $0x20] sm:$0xff] }
 0x16c   : > { %v609_v55 = vsel %vm526_vm1, %v596_v50, 0.0  ;;  %v534_v0 = vsel %vm526_vm1, %v522_v54, 0.0  ;;  %v629_v54 = vld [vmem:[%s1658_s3 + $0x38] sm:$0xff] }
 0x16d   : > { %v506_v58 = vpop.permute.xlu1 %505  ;;  %v588_v59 = vpop.permute.xlu0 %587  ;;  %v610_v63 = vadd.f32 %v609_v55, %v608_v57  ;;  %v535_v7 = vadd.f32 %v534_v0, %v533_v2 }
 0x16e   : > { %v523_v61 = vmul.f32 %v506_v58, %v475_v28  ;;  %v597_v62 = vmul.f32 %v588_v59, %v477_v52 }
 0x170   : > { %v611_v1 = vsel %vm526_vm1, %v597_v62, 0.0  ;;  %v536_v5 = vsel %vm526_vm1, %v523_v61, 0.0 }
 0x171   : > { %v612_v3 = vadd.f32 %v611_v1, %v610_v63  ;;  %v511_v4 = vpop.permute.xlu1 %510  ;;  %v537_v10 = vadd.f32 %v536_v5, %v535_v7 }
 0x172   : > { %v524_v6 = vmul.f32 %v511_v4, %v476_v40  ;;  %v625_v40 = vld [vmem:[%s1658_s3 + $0x18] sm:$0xff] }
 0x173   : > { %v613_v8 = vrot.slane %v612_v3, 4 }
 0x174   : > { %v538_v9 = vsel %vm526_vm1, %v524_v6, 0.0 }
 0x175   : > { %v614_v11 = vadd.f32 %v613_v8, %v612_v3  ;;  %v516_v12 = vpop.permute.xlu1 %515  ;;  %v539_v15 = vadd.f32 %v538_v9, %v537_v10 }
 0x176   : > { %v525_v13 = vmul.f32 %v516_v12, %v477_v52 }
 0x177   : > { %v615_v14 = vrot.slane %v614_v11, 2 }
 0x178   : > { %v540_v16 = vsel %vm526_vm1, %v525_v13, 0.0 }
 0x179   : > { %v616_v17 = vadd.f32 %v615_v14, %v614_v11  ;;  %v541_v18 = vadd.f32 %v540_v16, %v539_v15 }
 0x17b   : > { %v542_v19 = vrot.slane %v541_v18, 4  ;;  %v617_v20 = vrot.slane %v616_v17, 1 }
 0x17d   : > { %v543_v21 = vadd.f32 %v542_v19, %v541_v18  ;;  %v618_v23 = vadd.f32 %v617_v20, %v616_v17 }
 0x17f   : > { %v544_v22 = vrot.slane %v543_v21, 2  ;;  %v619_v28 = vadd.f32 %v618_v23, %v469_v26 }
 0x181   : > { %v545_v25 = vadd.f32 %v544_v22, %v543_v21  ;;  %v620_v32 = vmax.f32 %v619_v28, 0.0 }
 0x183   : > { %v546_v27 = vrot.slane %v545_v25, 1 }
 0x185   : > { %v547_v30 = vadd.f32 %v546_v27, %v545_v25 }
 0x187   : > { %v548_v31 = vadd.f32 %v547_v30, %v469_v26 }
 0x189   : > { %v549_v34 = vmax.f32 %v548_v31, 0.0 }
 0x18b   : > { %v621_v35 = vadd.f32 %v620_v32, %v549_v34 }
 0x18d   : > { %v633_v38 = vrot.slane %v621_v35, %v632_v33 }
 0x18f   : > { %v635_v41 = vmul.f32 %v633_v38, %v623_v36  ;;  %v634_v42 = vmul.f32 %v633_v38, %v622_v37  ;;  %v636_v45 = vmul.f32 %v633_v38, %v624_v39  ;;  %v637_v46 = vmul.f32 %v633_v38, %v625_v40 }
 0x190   : > { %v638_v51 = vmul.f32 %v633_v38, %v626_v47  ;;  %v639_v52 = vmul.f32 %v633_v38, %v627_v48  ;;  %v640_v57 = vmul.f32 %v633_v38, %v628_v53  ;;  %v641_v58 = vmul.f32 %v633_v38, %v629_v54 }
 0x191   : > { %v645_v43 = vsel %vm526_vm1, %v635_v41, 0.0  ;;  %v642_v44 = vsel %vm526_vm1, %v634_v42, 0.0  ;;  %v648_v49 = vsel %vm526_vm1, %v636_v45, 0.0  ;;  %v651_v50 = vsel %vm526_vm1, %v637_v46, 0.0 }
 0x192   : > { %646 = vadd.xlane.f32.xlu0 %v645_v43  ;;  %643 = vadd.xlane.f32.xlu1 %v642_v44  ;;  %v654_v55 = vsel %vm526_vm1, %v638_v51, 0.0  ;;  %v657_v56 = vsel %vm526_vm1, %v639_v52, 0.0  ;;  %v660_v59 = vsel %vm526_vm1, %v640_v57, 0.0  ;;  %v663_v60 = vsel %vm526_vm1, %v641_v58, 0.0 }
 0x196   : > { %649 = vadd.xlane.f32.xlu0 %v648_v49  ;;  %652 = vadd.xlane.f32.xlu1 %v651_v50 }
 0x19a   : > { %655 = vadd.xlane.f32.xlu0 %v654_v55  ;;  %658 = vadd.xlane.f32.xlu1 %v657_v56 }
 0x19e   : > { %661 = vadd.xlane.f32.xlu0 %v660_v59  ;;  %664 = vadd.xlane.f32.xlu1 %v663_v60 }
 0x21b   : > { %v647_v61 = vpop.xlane.xlu0 %646  ;;  %v644_v62 = vpop.xlane.xlu1 %643 }
 0x21c   : > { %v1005_v63 = vmul.f32 -1.442695, %v647_v61  ;;  %v1004_v0 = vmul.f32 -1.442695, %v644_v62 }
 0x21e   : > { %1107 = vpow2.f32 %v1005_v63 }
 0x21f   : > { %1109 = vpow2.f32 %v1004_v0  ;;  %v650_v1 = vpop.xlane.xlu0 %649  ;;  %v653_v2 = vpop.xlane.xlu1 %652 }
 0x220   : > { %v1006_v3 = vmul.f32 -1.442695, %v650_v1  ;;  %v1007_v4 = vmul.f32 -1.442695, %v653_v2 }
 0x222   : > { %1111 = vpow2.f32 %v1006_v3 }
 0x223   : > { %1113 = vpow2.f32 %v1007_v4  ;;  %v656_v5 = vpop.xlane.xlu0 %655  ;;  %v659_v6 = vpop.xlane.xlu1 %658 }
 0x224   : > { %v1008_v7 = vmul.f32 -1.442695, %v656_v5  ;;  %v1009_v8 = vmul.f32 -1.442695, %v659_v6 }
 0x226   : > { %1115 = vpow2.f32 %v1008_v7 }
 0x227   : > { %1117 = vpow2.f32 %v1009_v8  ;;  %v662_v9 = vpop.xlane.xlu0 %661  ;;  %v665_v10 = vpop.xlane.xlu1 %664 }
 0x228   : > { %v1010_v11 = vmul.f32 -1.442695, %v662_v9  ;;  %v1011_v12 = vmul.f32 -1.442695, %v665_v10 }
 0x22a   : > { %1119 = vpow2.f32 %v1010_v11 }
 0x22b   : > { %v1108_v13 = vpop.eup %1107  ;;  %1121 = vpow2.f32 %v1011_v12 }
 0x22c   : > { %v1110_v14 = vpop.eup %1109  ;;  %v691_v15 = vadd.f32 1.0, %v1108_v13 }
 0x22d   : > { %v690_v16 = vadd.f32 1.0, %v1110_v14 }
 0x22e   : > { %1123 = vrcp.f32 %v691_v15 }
 0x22f   : > { %v1112_v17 = vpop.eup %1111  ;;  %1125 = vrcp.f32 %v690_v16 }
 0x230   : > { %v1114_v18 = vpop.eup %1113  ;;  %v692_v19 = vadd.f32 1.0, %v1112_v17 }
 0x231   : > { %v693_v20 = vadd.f32 1.0, %v1114_v18 }
 0x232   : > { %1127 = vrcp.f32 %v692_v19 }
 0x233   : > { %v1116_v21 = vpop.eup %1115  ;;  %1129 = vrcp.f32 %v693_v20 }
 0x234   : > { %v1118_v22 = vpop.eup %1117  ;;  %v694_v23 = vadd.f32 1.0, %v1116_v21 }
 0x235   : > { %v695_v24 = vadd.f32 1.0, %v1118_v22 }
 0x236   : > { %1131 = vrcp.f32 %v694_v23 }
 0x237   : > { %v1120_v25 = vpop.eup %1119  ;;  %1133 = vrcp.f32 %v695_v24 }
 0x238   : > { %v1122_v26 = vpop.eup %1121  ;;  %v696_v27 = vadd.f32 1.0, %v1120_v25 }
 0x239   : > { %v697_v28 = vadd.f32 1.0, %v1122_v26 }
 0x23a   : > { %1135 = vrcp.f32 %v696_v27 }
 0x23b   : > { %v1124_v29 = vpop.eup %1123  ;;  %1137 = vrcp.f32 %v697_v28 }
 0x23c   : > { %v1126_v30 = vpop.eup %1125  ;;  %716 = vst.msk [vmem:[%s1424_s6 + $0x8] sm:$0xff] %vm372_vm0, %v1124_v29  ;;  %v724_v31 = vadd.f32 1.0, %v1124_v29 }
 0x23d   : > { %715 = vst.msk [vmem:[%s1424_s6] sm:$0xff] %vm372_vm0, %v1126_v30  ;;  %v723_v32 = vadd.f32 1.0, %v1126_v30 }
 0x23e   : > { %732 = vst.msk [vmem:[#allocation4 + $0x8] sm:$0xff] %vm372_vm0, %v724_v31 }
 0x23f   : > { %v1128_v33 = vpop.eup %1127  ;;  %731 = vst.msk [vmem:[#allocation4] sm:$0xff] %vm372_vm0, %v723_v32 }
 0x240   : > { %v1130_v34 = vpop.eup %1129  ;;  %717 = vst.msk [vmem:[%s1424_s6 + $0x10] sm:$0xff] %vm372_vm0, %v1128_v33  ;;  %v725_v35 = vadd.f32 1.0, %v1128_v33 }
 0x241   : > { %718 = vst.msk [vmem:[%s1424_s6 + $0x18] sm:$0xff] %vm372_vm0, %v1130_v34  ;;  %v726_v36 = vadd.f32 1.0, %v1130_v34 }
 0x242   : > { %733 = vst.msk [vmem:[#allocation4 + $0x10] sm:$0xff] %vm372_vm0, %v725_v35 }
 0x243   : > { %v1132_v37 = vpop.eup %1131  ;;  %734 = vst.msk [vmem:[#allocation4 + $0x18] sm:$0xff] %vm372_vm0, %v726_v36 }
 0x244   : > { %v1134_v38 = vpop.eup %1133  ;;  %719 = vst.msk [vmem:[%s1424_s6 + $0x20] sm:$0xff] %vm372_vm0, %v1132_v37  ;;  %v727_v39 = vadd.f32 1.0, %v1132_v37 }
 0x245   : > { %720 = vst.msk [vmem:[%s1424_s6 + $0x28] sm:$0xff] %vm372_vm0, %v1134_v38  ;;  %v728_v40 = vadd.f32 1.0, %v1134_v38 }
 0x246   : > { %735 = vst.msk [vmem:[#allocation4 + $0x20] sm:$0xff] %vm372_vm0, %v727_v39 }
 0x247   : > { %v1136_v41 = vpop.eup %1135  ;;  %736 = vst.msk [vmem:[#allocation4 + $0x28] sm:$0xff] %vm372_vm0, %v728_v40 }
 0x248   : > { %v1138_v42 = vpop.eup %1137  ;;  %721 = vst.msk [vmem:[%s1424_s6 + $0x30] sm:$0xff] %vm372_vm0, %v1136_v41  ;;  %v729_v43 = vadd.f32 1.0, %v1136_v41 }
 0x249   : > { %722 = vst.msk [vmem:[%s1424_s6 + $0x38] sm:$0xff] %vm372_vm0, %v1138_v42  ;;  %v730_v44 = vadd.f32 1.0, %v1138_v42 }
 0x24a   : > { %737 = vst.msk [vmem:[#allocation4 + $0x30] sm:$0xff] %vm372_vm0, %v729_v43 }
 0x24b   : > { %738 = vst.msk [vmem:[#allocation4 + $0x38] sm:$0xff] %vm372_vm0, %v730_v44 }
 0x24c PF: > { %p1012_p1 = scmp.ne.s32.totalorder %s1249_s21, 1 }
 0x24e   : > { %742 = sbr.rel (%p1012_p1) target bundleno = 737 (0x2e1), region = 60 }
 0x253   : > { %v745_v45 = vld [vmem:[#allocation4 + $0x10] sm:$0xff]  ;;  %v743_v46 = vld [vmem:[#allocation4] sm:$0xff]  ;;  %v1271_v47 = vmov 0   ;;  %v746_v48 = vld [vmem:[#allocation4 + $0x18] sm:$0xff] }
 0x254   : > { %1140 = vset.pattern.permute.xlu1 %v1271_v47  ;;  %1139 = vset.pattern.permute.xlu0 %v1271_v47  ;;  %v744_v49 = vld [vmem:[#allocation4 + $0x8] sm:$0xff]  ;;  %v747_v51 = vld [vmem:[#allocation4 + $0x20] sm:$0xff]  ;;  %v750_v52 = vld [vmem:[#allocation4 + $0x38] sm:$0xff] }
 0x255   : > { %779 = vperm.xlu1 %1140, %v745_v45   ;;  %769 = vperm.xlu0 %1139, %v743_v46   ;;  %v748_v50 = vld [vmem:[#allocation4 + $0x28] sm:$0xff]  ;;  %v749_v53 = vld [vmem:[#allocation4 + $0x30] sm:$0xff]  ;;  %v755_v54 = vld [vmem:[%s1406_s26 + $0x20] sm:$0xff] }
 0x256   : > { %v756_v55 = vld [vmem:[%s1406_s26 + $0x28] sm:$0xff]  ;;  %v751_v56 = vld [vmem:[%s1406_s26] sm:$0xff]  ;;  %v757_v0 = vld [vmem:[%s1406_s26 + $0x30] sm:$0xff] }
 0x257   : > { %v752_v57 = vld [vmem:[%s1406_s26 + $0x8] sm:$0xff]  ;;  %v758_v1 = vld [vmem:[%s1406_s26 + $0x38] sm:$0xff]  ;;  %v753_v2 = vld [vmem:[%s1406_s26 + $0x10] sm:$0xff] }
 0x258   : > { %v754_v3 = vld [vmem:[%s1406_s26 + $0x18] sm:$0xff]  ;;  %v761_v10 = vld [vmem:[%s1406_s26 + $0x50] sm:$0xff]  ;;  %v759_v12 = vld [vmem:[%s1406_s26 + $0x40] sm:$0xff] }
 0x259   : > { %784 = vperm.xlu1 %1140, %v746_v48   ;;  %774 = vperm.xlu0 %1139, %v744_v49   ;;  %v762_v11 = vld [vmem:[%s1406_s26 + $0x58] sm:$0xff]  ;;  %v760_v13 = vld [vmem:[%s1406_s26 + $0x48] sm:$0xff]  ;;  %v765_v20 = vld [vmem:[%s1406_s26 + $0x70] sm:$0xff] }
 0x25a   : > { %v766_v21 = vld [vmem:[%s1406_s26 + $0x78] sm:$0xff]  ;;  %v763_v22 = vld [vmem:[%s1406_s26 + $0x60] sm:$0xff]  ;;  %v764_v23 = vld [vmem:[%s1406_s26 + $0x68] sm:$0xff] }
 0x25d   : > { %794 = vperm.xlu1 %1140, %v748_v50   ;;  %789 = vperm.xlu0 %1139, %v747_v51  }
 0x261   : > { %804 = vperm.xlu1 %1140, %v750_v52   ;;  %799 = vperm.xlu0 %1139, %v749_v53  }
 0x2d0   : > { %v780_v58 = vpop.permute.xlu1 %779  ;;  %v770_v59 = vpop.permute.xlu0 %769 }
 0x2d1   : > { %v811_v60 = vmul.f32 %v780_v58, %v755_v54  ;;  %v812_v61 = vmul.f32 %v780_v58, %v756_v55  ;;  %v807_v62 = vmul.f32 %v770_v59, %v751_v56  ;;  %v808_v63 = vmul.f32 %v770_v59, %v752_v57 }
 0x2d3   : > { %827 = vst [vmem:[%s1426_s11 + $0x20] sm:$0xff] %v811_v60  ;;  %828 = vst [vmem:[%s1426_s11 + $0x28] sm:$0xff] %v812_v61 }
 0x2d4   : > { %823 = vst [vmem:[%s1426_s11] sm:$0xff] %v807_v62  ;;  %824 = vst [vmem:[%s1426_s11 + $0x8] sm:$0xff] %v808_v63  ;;  %v785_v4 = vpop.permute.xlu1 %784  ;;  %v775_v5 = vpop.permute.xlu0 %774 }
 0x2d5   : > { %v813_v6 = vmul.f32 %v785_v4, %v757_v0  ;;  %v814_v7 = vmul.f32 %v785_v4, %v758_v1  ;;  %v809_v8 = vmul.f32 %v775_v5, %v753_v2  ;;  %v810_v9 = vmul.f32 %v775_v5, %v754_v3 }
 0x2d7   : > { %829 = vst [vmem:[%s1426_s11 + $0x30] sm:$0xff] %v813_v6  ;;  %830 = vst [vmem:[%s1426_s11 + $0x38] sm:$0xff] %v814_v7 }
 0x2d8   : > { %825 = vst [vmem:[%s1426_s11 + $0x10] sm:$0xff] %v809_v8  ;;  %826 = vst [vmem:[%s1426_s11 + $0x18] sm:$0xff] %v810_v9  ;;  %v795_v14 = vpop.permute.xlu1 %794  ;;  %v790_v15 = vpop.permute.xlu0 %789 }
 0x2d9   : > { %v817_v16 = vmul.f32 %v795_v14, %v761_v10  ;;  %v818_v17 = vmul.f32 %v795_v14, %v762_v11  ;;  %v815_v18 = vmul.f32 %v790_v15, %v759_v12  ;;  %v816_v19 = vmul.f32 %v790_v15, %v760_v13 }
 0x2db   : > { %833 = vst [vmem:[%s1426_s11 + $0x50] sm:$0xff] %v817_v16  ;;  %834 = vst [vmem:[%s1426_s11 + $0x58] sm:$0xff] %v818_v17 }
 0x2dc   : > { %831 = vst [vmem:[%s1426_s11 + $0x40] sm:$0xff] %v815_v18  ;;  %832 = vst [vmem:[%s1426_s11 + $0x48] sm:$0xff] %v816_v19  ;;  %v805_v24 = vpop.permute.xlu1 %804  ;;  %v800_v25 = vpop.permute.xlu0 %799 }
 0x2dd   : > { %v821_v26 = vmul.f32 %v805_v24, %v765_v20  ;;  %v822_v27 = vmul.f32 %v805_v24, %v766_v21  ;;  %v819_v28 = vmul.f32 %v800_v25, %v763_v22  ;;  %v820_v29 = vmul.f32 %v800_v25, %v764_v23 }
 0x2df   : > { %837 = vst [vmem:[%s1426_s11 + $0x70] sm:$0xff] %v821_v26  ;;  %838 = vst [vmem:[%s1426_s11 + $0x78] sm:$0xff] %v822_v27 }
 0x2e0   : > { %835 = vst [vmem:[%s1426_s11 + $0x60] sm:$0xff] %v819_v28  ;;  %836 = vst [vmem:[%s1426_s11 + $0x68] sm:$0xff] %v820_v29 }
 0x2e1 PF: > { %s1020_s21 = sshll.u32 %s1253_s22, 11  ;;  %s861_s13 = sshll.u32 %s1426_s11, 4  ;;  %s1602_s13 = int_to_ptr.vmem [resolvable:$true] %s861_s13 }
 0x2e2   : > { %s1599_s15 = scalar_lea.hbm %s1659_s4, %s1020_s21  ;;  %s840_s7 = scalar_lea.sflag [#allocation7], %s1402_s28 }
 0x2e3   : > { %s1169_s14 = scalar_lea.vmem %s1602_s13, 2048  ;;  %s1272_s16 = smov [#allocation8]  }
 0x2e4   : > { %p1170_p4 = scmp.ne.s32.totalorder %s1602_s13, %s1169_s14  ;;  %s1173_s17 = sshll.u32 %s1272_s16, 4  ;;  %s1174_s17 = int_to_ptr.vmem [resolvable:$false] %s1173_s17 }
 0x2e5   : > { %s1175_s22 = scalar_lea.vmem %s1174_s17, 4096  ;;  %p1176_p7 = scmp.lt.s32.totalorder %s1602_s13, %s1174_s17 }
 0x2e6   : > { %p1171_p5 = pnand %p1170_p4, %p1368_p10  ;;  %p1177_p8 = scmp.lt.s32.totalorder %s1175_s22, %s1169_s14 }
 0x2e8   : > { %p1172_p6 = pneg %p1171_p5  ;;  %p1178_p12 = por %p1177_p8, %p1176_p7 }
 0x2ea   : > { %p1179_p3 = pnand %p1178_p12, %p1172_p6 }
 0x2ec   : > { %1182 = shalt.err (!%p1179_p3)
}
 0x2ed   : > { %s1183_s11 = scalar_lea.hbm %s1599_s15, 2048  ;;  %s1187_s29 = scalar_lea.hbm %s1659_s4, 4096 }
 0x2ee   : > { %p1184_p13 = scmp.ne.s32.totalorder %s1599_s15, %s1183_s11  ;;  %p1188_p9 = scmp.lt.s32.totalorder %s1599_s15, %s1659_s4 }
 0x2ef   : > { %p1189_p1 = scmp.lt.s32.totalorder %s1187_s29, %s1183_s11 }
 0x2f0   : > { %p1185_p2 = pnand %p1184_p13, %p1368_p10 }
 0x2f1   : > { %p1190_p4 = por %p1189_p1, %p1188_p9 }
 0x2f2   : > { %p1186_p0 = pneg %p1185_p2 }
 0x2f4   : > { %p1191_p5 = pnand %p1190_p4, %p1186_p0 }
 0x2f6   : > { %1194 = shalt.err (!%p1191_p5)
}
 0x2f7   : > { %s1273_s26 = smov 256   ;;  %s1274_s6 = smov 16  }
 0x2f8   : > { %1023 = dma.vmem_to_hbm [thread:$0]  (%p1368_p10), %s1602_s13, 2048, %s1599_s15, %s840_s7, %s1273_s26, %s1273_s26, %s1274_s6  }
 0x2f9 PF: > { %p1034_p6 = scmp.ge.s32.totalorder %s1265_s25, 2  ;;  %s879_s14 = sand.u32 1, %s1237_s18  }
 0x2fa   : > { %s880_s16 = scalar_lea.sflag [#allocation7], %s879_s14 }
 0x2fb   : > { %p1030_p7 = pnand %p1034_p6, %p1374_p11 }
 0x2fd   : > { %p1031_p8 = pneg %p1030_p7 }
 0x2ff   : > { %1232 = dma.done.wait (%p1031_p8), %s880_s16, 2048  }
 0x300   : > { %1234 = vsyncadd (%p1031_p8), %s880_s16, 4294965248  ;;  %s22_s25 = sadd.s32 1, %s1265_s25   ;;  %s1669_s8 = sld [smem:[#allocation11_spill]] }
 0x301   : > { %p19_p12 = scmp.ge.s32.totalorder %s22_s25, 6   ;;  %s1670_s28 = sld [smem:[#allocation12_spill]] }
 0x302   : > { %s1671_s18 = smov %s1241_s19  ;;  %s1672_s19 = smov %s1245_s20 }
 0x303   : > { %s1673_s20 = smov %s1381_s12  ;;  %s1674_s21 = smov %s1257_s23 }
 0x304   : > { %s1675_s22 = smov %s1261_s24  ;;  %21 = sbr.rel (!%p19_p12) target bundleno = 7 (0x7), region = 116 }
 0x306   : > { %s1676_s23 = smov %s1669_s8 }
 0x307   : > { %s1677_s24 = smov %s1670_s28 }
 0x309   :  { %893 = vsyncpa [#allocation6], 1 }
 0x30a   :  { %895 = vsyncpa [#allocation6 + $0x1], 1 }
 0x30b   :  { %896 = vsyncpa [#allocation7], 1 }
 0x30c   :  { %898 = vsyncpa [#allocation7 + $0x1], 1 }

</bundles_post_ra>
